<compile_context>
chip_gen: v6e
topology: v6e:2x2x1
jax: 0.10.0
libtpu: 0.0.40
codegen_flags: <defaults>
</compile_context>

<pallas_src>
import functools

import jax
import jax.numpy as jnp
import numpy as np
from jax import lax
from jax.experimental import pallas as pl
from jax.experimental.pallas import tpu as pltpu


# ---------------------------------------------------------------------------
# Kernel body (shared by the fused and the grid-over-batch paths)
# ---------------------------------------------------------------------------
def _semantic_tokens_kernel(x_ref, w_ref, o_ref, *, n_batch, n_spatial,
                            compute_dtype):
    """x_ref: (C, n_batch*N), w_ref: (L, C), o_ref: (n_batch, C, L)."""
    xc = x_ref[...].astype(compute_dtype)                     # (C, n_batch*N)
    wc = w_ref[...].astype(compute_dtype)                     # (L, C)

    # One wide matmul for the whole batch block: fills the MXU lane dimension
    # and amortizes push/drain over n_batch images.
    logits = jnp.dot(wc, xc, preferred_element_type=jnp.float32)  # (L, n_batch*N)

    # Per-image softmax + token contraction. n_batch is small and static, so
    # the Python loop unrolls (equivalent to lax.fori_loop(..., unroll=True)).
    for b in range(n_batch):
        lo = b * n_spatial
        hi = lo + n_spatial
        lb = logits[:, lo:hi]                                  # (L, N) lane-aligned
        xb = xc[:, lo:hi]                                      # (C, N)

        m = jnp.max(lb, axis=-1, keepdims=True)                # (L, 1)
        e = jnp.exp(lb - m)                                    # (L, N), f32
        denom = jnp.sum(e, axis=-1, keepdims=True)             # (L, 1)

        # EUP reciprocal + one Newton-Raphson step -> ~f32-exact, off the VALU.
        inv = pl.reciprocal(denom, approx=True)
        inv = inv * (2.0 - denom * inv)
        attn = e * inv                                         # normalized (L, N)

        # Flipped contraction (contract N on both operands): the hidden XLU
        # transpose lands on the small (L, N) operand; result is (C, L).
        tok_cl = lax.dot_general(
            xb, attn.astype(compute_dtype),
            (((1,), (1,)), ((), ())),
            preferred_element_type=jnp.float32)                # (C, L)

        o_ref[b] = tok_cl.astype(o_ref.dtype)


# ---------------------------------------------------------------------------
# VMEM budgeting helpers
# ---------------------------------------------------------------------------
def _vmem_budget_bytes():
    cap = None
    try:
        cap = getattr(pltpu.get_tpu_info(), "vmem_capacity_bytes", None)
    except Exception:
        cap = None
    if not cap:
        cap = 64 * 1024 * 1024  # conservative: v7x per-TC physical VMEM
    return int(0.75 * cap)


def _fused_bytes(B, C, N, L, itemsize):
    x_b = C * B * N * itemsize
    w_b = L * C * itemsize
    o_b = B * C * L * itemsize
    tmp = 3 * L * B * N * 4          # logits / exp / attn intermediates (f32)
    return x_b + w_b + o_b + tmp


def _block_bytes(bb, C, N, L, itemsize):
    # double-buffered pipeline copies of the per-step blocks + f32 intermediates
    x_b = 2 * C * bb * N * itemsize
    w_b = 2 * L * C * itemsize
    o_b = 2 * bb * C * L * itemsize
    tmp = 3 * L * bb * N * 4
    return x_b + w_b + o_b + tmp


def _pick_block_batch(B, C, N, L, itemsize, budget):
    # Largest divisor of B whose (double-buffered) block fits the budget and
    # keeps the x-block lane dimension 128-aligned (or covers the full batch).
    for bb in sorted((d for d in range(1, B + 1) if B % d == 0), reverse=True):
        lane_ok = ((bb * N) % 128 == 0) or (bb == B)
        if lane_ok and _block_bytes(bb, C, N, L, itemsize) <= budget:
            return bb
    return B if (N % 128 != 0) else 1


# ---------------------------------------------------------------------------
# Wrapper
# ---------------------------------------------------------------------------
def semantic_tokens(x, w, *, grid_over_batch=None, block_batch=None,
                    compute_dtype=None):
    """x: (B, C, N), w: (L, C)  ->  tokens: (B, L, C)."""
    B, C, N = x.shape
    L, Cw = w.shape
    assert Cw == C
    if compute_dtype is None:
        # bf16 is opt-in only: it would break the 1e-5 tolerance vs. the f32
        # reference; the softmax epilogue stays f32 regardless.
        compute_dtype = jnp.float32

    itemsize = jnp.dtype(x.dtype).itemsize
    budget = _vmem_budget_bytes()

    # Fold batch into the lane dimension once, in the XLA wrapper:
    # x_cbn[c, b*N + n] = x[b, c, n].
    x_cbn = jnp.transpose(x, (1, 0, 2)).reshape(C, B * N)

    if grid_over_batch is None:
        # VMEM-byte-budget gate (not a batch-count heuristic): fused single
        # call while the whole problem fits comfortably, else pipeline over
        # batch blocks. On v7x, grid_over_batch=True can additionally shard the
        # 'parallel' batch axis across both TensorCores for large per-step work.
        grid_over_batch = _fused_bytes(B, C, N, L, itemsize) > budget

    out_bcl_shape = jax.ShapeDtypeStruct((B, C, L), x.dtype)

    if not grid_over_batch:
        kern = functools.partial(_semantic_tokens_kernel, n_batch=B,
                                 n_spatial=N, compute_dtype=compute_dtype)
        out_bcl = pl.pallas_call(
            kern,
            out_shape=out_bcl_shape,
            in_specs=[pl.BlockSpec(memory_space=pltpu.MemorySpace.VMEM),
                      pl.BlockSpec(memory_space=pltpu.MemorySpace.VMEM)],
            out_specs=pl.BlockSpec(memory_space=pltpu.MemorySpace.VMEM),
            compiler_params=pltpu.CompilerParams(vmem_limit_bytes=budget),
        )(x_cbn, w)
    else:
        bb = block_batch if block_batch is not None else _pick_block_batch(
            B, C, N, L, itemsize, budget)
        assert B % bb == 0, "block_batch must divide the batch size"
        # TODO(synk): for N too large (or not 128-aligned) to hold a (C, bb*N)
        # slab per step, add an inner N-tiling / online softmax over N chunks.
        kern = functools.partial(_semantic_tokens_kernel, n_batch=bb,
                                 n_spatial=N, compute_dtype=compute_dtype)
        out_bcl = pl.pallas_call(
            kern,
            out_shape=out_bcl_shape,
            grid=(B // bb,),
            in_specs=[pl.BlockSpec((C, bb * N), lambda i: (0, i)),
                      pl.BlockSpec((L, C), lambda i: (0, 0))],
            out_specs=pl.BlockSpec((bb, C, L), lambda i: (i, 0, 0)),
            compiler_params=pltpu.CompilerParams(
                dimension_semantics=("parallel",),
                vmem_limit_bytes=budget),
        )(x_cbn, w)

    # (B, C, L) -> (B, L, C); tiny output, free in XLA.
    return jnp.transpose(out_bcl, (0, 2, 1))


def semantic_tokens_ref(x, w):
    logits = jnp.einsum('lc,bcn->bln', w, x)
    attn = jax.nn.softmax(logits, axis=-1)
    return jnp.einsum('bln,bcn->blc', attn, x)


if __name__ == "__main__":
    # Module defaults: channel=64, token_len=16; small spatial extent N=128.
    B, C, N, L = 2, 64, 128, 16

    key = jax.random.PRNGKey(0)
    kx, kw = jax.random.split(key)
    x = jax.random.normal(kx, (B, C, N), dtype=jnp.float32)
    # Deterministic kaiming-uniform-like init for the 1x1 conv weight (L, C).
    bound = 1.0 / np.sqrt(C)
    w = jax.random.uniform(kw, (L, C), dtype=jnp.float32,
                           minval=-bound, maxval=bound)

    ref = semantic_tokens_ref(x, w)

    # Default path (VMEM-budget gate -> fused single call at these sizes).
    out_fused = jax.block_until_ready(semantic_tokens(x, w))
    np.testing.assert_allclose(np.asarray(out_fused), np.asarray(ref),
                               rtol=1e-5, atol=1e-5)

    # Grid-over-batch path (what large-B / v7x dual-TC shapes would use),
    # forced with one image per step to exercise the pipeline & index maps.
    out_grid = jax.block_until_ready(
        semantic_tokens(x, w, grid_over_batch=True, block_batch=1))
    np.testing.assert_allclose(np.asarray(out_grid), np.asarray(ref),
                               rtol=1e-5, atol=1e-5)

    print("KERNEL_OK")
</pallas_src>

<mosaic_0001>
module attributes {stable_mosaic.version = 11 : i64} {
  func.func @_semantic_tokens_kernel(%arg0: memref<64x256xf32, #tpu.memory_space<vmem>>, %arg1: memref<16x64xf32, #tpu.memory_space<vmem>>, %arg2: memref<2x64x16xf32, #tpu.memory_space<vmem>>) attributes {dimension_semantics = [], scalar_prefetch = 0 : i64, scratch_operands = 0 : i64, tpu.core_type = #tpu.core_type<tc>} {
    %c0 = arith.constant 0 : index
    %c0_0 = arith.constant 0 : index
    %0 = vector.load %arg0[%c0, %c0_0] : memref<64x256xf32, #tpu.memory_space<vmem>>, vector<64x256xf32>
    %c0_1 = arith.constant 0 : index
    %c0_2 = arith.constant 0 : index
    %1 = vector.load %arg1[%c0_1, %c0_2] : memref<16x64xf32, #tpu.memory_space<vmem>>, vector<16x64xf32>
    %cst = arith.constant dense<0.000000e+00> : vector<16x256xf32>
    %2 = tpu.matmul %1, %0, %cst {dimension_numbers = #tpu.dot_dimension_numbers<[1], [0], [0], [1], [0, 0, 1, 1], [], []>} : vector<16x64xf32>, vector<64x256xf32>, vector<16x256xf32> -> vector<16x256xf32>
    %3 = vector.extract_strided_slice %2 {offsets = [0, 0], sizes = [16, 128], strides = [1, 1]} : vector<16x256xf32> to vector<16x128xf32>
    %4 = vector.extract_strided_slice %0 {offsets = [0, 0], sizes = [64, 128], strides = [1, 1]} : vector<64x256xf32> to vector<64x128xf32>
    %cst_3 = arith.constant dense<0xFF800000> : vector<16xf32>
    %5 = vector.multi_reduction <maximumf>, %3, %cst_3 [1] : vector<16x128xf32> to vector<16xf32>
    %6 = vector.shape_cast %5 : vector<16xf32> to vector<16x1xf32>
    %7 = vector.broadcast %6 : vector<16x1xf32> to vector<16x128xf32>
    %8 = arith.subf %3, %7 : vector<16x128xf32>
    %9 = math.exp %8 : vector<16x128xf32>
    %cst_4 = arith.constant dense<0.000000e+00> : vector<16xf32>
    %10 = vector.multi_reduction <add>, %9, %cst_4 [1] : vector<16x128xf32> to vector<16xf32>
    %11 = vector.shape_cast %10 : vector<16xf32> to vector<16x1xf32>
    %12 = tpu.reciprocal %11 {approx = true} : vector<16x1xf32> -> vector<16x1xf32>
    %13 = arith.mulf %11, %12 : vector<16x1xf32>
    %cst_5 = arith.constant 2.000000e+00 : f32
    %14 = vector.broadcast %cst_5 : f32 to vector<16x1xf32>
    %15 = arith.subf %14, %13 : vector<16x1xf32>
    %16 = arith.mulf %12, %15 : vector<16x1xf32>
    %17 = vector.broadcast %16 : vector<16x1xf32> to vector<16x128xf32>
    %18 = arith.mulf %9, %17 : vector<16x128xf32>
    %cst_6 = arith.constant dense<0.000000e+00> : vector<64x16xf32>
    %19 = tpu.matmul %4, %18, %cst_6 {dimension_numbers = #tpu.dot_dimension_numbers<[1], [1], [0], [0], [0, 0, 1, 0], [], []>} : vector<64x128xf32>, vector<16x128xf32>, vector<64x16xf32> -> vector<64x16xf32>
    %c0_7 = arith.constant 0 : index
    %c0_8 = arith.constant 0 : index
    %c0_9 = arith.constant 0 : index
    %20 = vector.load %arg2[%c0_7, %c0_8, %c0_9] : memref<2x64x16xf32, #tpu.memory_space<vmem>>, vector<1x64x16xf32>
    %21 = vector.shape_cast %20 : vector<1x64x16xf32> to vector<64x16xf32>
    %22 = vector.shape_cast %19 : vector<64x16xf32> to vector<1x64x16xf32>
    tpu.vector_store %arg2[%c0_7, %c0_8, %c0_9], %22 {strides = array<i32>} : memref<2x64x16xf32, #tpu.memory_space<vmem>>, vector<1x64x16xf32>,
    %23 = vector.extract_strided_slice %2 {offsets = [0, 128], sizes = [16, 128], strides = [1, 1]} : vector<16x256xf32> to vector<16x128xf32>
    %24 = vector.extract_strided_slice %0 {offsets = [0, 128], sizes = [64, 128], strides = [1, 1]} : vector<64x256xf32> to vector<64x128xf32>
    %cst_10 = arith.constant dense<0xFF800000> : vector<16xf32>
    %25 = vector.multi_reduction <maximumf>, %23, %cst_10 [1] : vector<16x128xf32> to vector<16xf32>
    %26 = vector.shape_cast %25 : vector<16xf32> to vector<16x1xf32>
    %27 = vector.broadcast %26 : vector<16x1xf32> to vector<16x128xf32>
    %28 = arith.subf %23, %27 : vector<16x128xf32>
    %29 = math.exp %28 : vector<16x128xf32>
    %cst_11 = arith.constant dense<0.000000e+00> : vector<16xf32>
    %30 = vector.multi_reduction <add>, %29, %cst_11 [1] : vector<16x128xf32> to vector<16xf32>
    %31 = vector.shape_cast %30 : vector<16xf32> to vector<16x1xf32>
    %32 = tpu.reciprocal %31 {approx = true} : vector<16x1xf32> -> vector<16x1xf32>
    %33 = arith.mulf %31, %32 : vector<16x1xf32>
    %cst_12 = arith.constant 2.000000e+00 : f32
    %34 = vector.broadcast %cst_12 : f32 to vector<16x1xf32>
    %35 = arith.subf %34, %33 : vector<16x1xf32>
    %36 = arith.mulf %32, %35 : vector<16x1xf32>
    %37 = vector.broadcast %36 : vector<16x1xf32> to vector<16x128xf32>
    %38 = arith.mulf %29, %37 : vector<16x128xf32>
    %cst_13 = arith.constant dense<0.000000e+00> : vector<64x16xf32>
    %39 = tpu.matmul %24, %38, %cst_13 {dimension_numbers = #tpu.dot_dimension_numbers<[1], [1], [0], [0], [0, 0, 1, 0], [], []>} : vector<64x128xf32>, vector<16x128xf32>, vector<64x16xf32> -> vector<64x16xf32>
    %c1 = arith.constant 1 : index
    %c0_14 = arith.constant 0 : index
    %c0_15 = arith.constant 0 : index
    %40 = vector.load %arg2[%c1, %c0_14, %c0_15] : memref<2x64x16xf32, #tpu.memory_space<vmem>>, vector<1x64x16xf32>
    %41 = vector.shape_cast %40 : vector<1x64x16xf32> to vector<64x16xf32>
    %42 = vector.shape_cast %39 : vector<64x16xf32> to vector<1x64x16xf32>
    tpu.vector_store %arg2[%c1, %c0_14, %c0_15], %42 {strides = array<i32>} : memref<2x64x16xf32, #tpu.memory_space<vmem>>, vector<1x64x16xf32>,
    return
  }
}

</mosaic_0001>

<bundles_post_ra>
// kernel: tpu_custom_call.1
= control target key start
LH: loop header
LB: loop body
LE: loop exit
PB: predicated region body
PF: predicated region fallthrough
CT: control target
= control target key end

     0   :  { %7 = vsyncpa [#allocation3], 0  ;;  %s704_s0 = inlined_call_operand.hbm [shape: f32[64,256], index: 0, kind: input, shape index: {}]   ;;  %s705_s1 = inlined_call_operand.hbm [shape: f32[16,64], index: 1, kind: input, shape index: {}]   ;;  %s706_s2 = inlined_call_operand.vmem [shape: f32[2,64,16], index: 2, kind: output, shape index: {}]  }
   0x1   :  { %8 = vsyncpa [#allocation5], 0  ;;  %s556_s9 = smov [#allocation2]  }
   0x2   :  { %s14_s10 = sshll.u32 %s556_s9, 4  ;;  %s15_s10 = int_to_ptr.vmem [resolvable:$true] %s14_s10 }
   0x3   :  { %s520_s11 = scalar_lea.vmem %s15_s10, 2048  ;;  %p525_p1 = scmp.lt.s32.totalorder %s15_s10, %s15_s10 }
   0x4   :  { %p521_p0 = scmp.ne.s32.totalorder %s15_s10, %s520_s11  ;;  %p526_p2 = scmp.lt.s32.totalorder %s520_s11, %s520_s11 }
   0x6   :  { %p527_p3 = por %p526_p2, %p525_p1 }
   0x8   :  { %p528_p4 = pnand %p527_p3, %p521_p0 }
   0xa   :  { %531 = shalt.err (!%p528_p4)
}
   0xb   :  { %s557_s12 = smov 256   ;;  %s558_s13 = smov 16  }
   0xc   :  { %20 = dma.hbm_to_vmem [thread:$0]  %s704_s0, 2048, %s15_s10, [#allocation3], %s557_s12, %s557_s12, %s558_s13  }
   0xd   :  { %s559_s16 = smov [#allocation4]  }
   0xe   :  { %s26_s17 = sshll.u32 %s559_s16, 4  ;;  %s27_s17 = int_to_ptr.vmem [resolvable:$true] %s26_s17 }
   0xf   :  { %s540_s18 = scalar_lea.vmem %s27_s17, 256  ;;  %p545_p6 = scmp.lt.s32.totalorder %s27_s17, %s27_s17 }
  0x10   :  { %p541_p5 = scmp.ne.s32.totalorder %s27_s17, %s540_s18  ;;  %p546_p7 = scmp.lt.s32.totalorder %s540_s18, %s540_s18 }
  0x12   :  { %p547_p8 = por %p546_p7, %p545_p6 }
  0x14   :  { %p548_p9 = pnand %p547_p8, %p541_p5 }
  0x16   :  { %551 = shalt.err (!%p548_p9)
}
  0x17   :  { %s560_s19 = smov 128   ;;  %s561_s20 = smov 8  }
  0x18   :  { %32 = dma.hbm_to_vmem [thread:$0]  %s705_s1, 256, %s27_s17, [#allocation5], %s560_s19, %s560_s19, %s561_s20  }
  0x19   :  { %552 = dma.done.wait [#allocation3], 2048  }
  0x1a   :  { %553 = vsyncadd [#allocation3], 4294965248 }
  0x1b   :  { %554 = dma.done.wait [#allocation5], 256  }
  0x1c   :  { %555 = vsyncadd [#allocation5], 4294967040  ;;  %v562_v0 = vmov 0.0   ;;  %v584_v1 = vld [vmem:[#allocation2 + $0x78] sm:$0xff]  ;;  %v586_v2 = vld [vmem:[#allocation2 + $0x70] sm:$0xff]  ;;  %vm57_vm0 = vcmask 523264  }
  0x1d   :  { %128 = vmatprep.mubr.f32.mxu0 %v562_v0  ;;  %v588_v3 = vld [vmem:[#allocation2 + $0x68] sm:$0xff]  ;;  %80 = vmatprep.subr.mxu0 %v584_v1  ;;  %v591_v4 = vld [vmem:[#allocation2 + $0x60] sm:$0xff]  ;;  %v594_v5 = vld [vmem:[#allocation2 + $0x58] sm:$0xff]  ;;  %vm270_vm1 = vcmask 130048  }
  0x1e   :  { %81 = vmatpush1.msra.mxu0 %v586_v2  ;;  %v597_v6 = vld [vmem:[#allocation2 + $0x50] sm:$0xff]  ;;  %v600_v7 = vld [vmem:[#allocation2 + $0x48] sm:$0xff]  ;;  %v603_v8 = vld [vmem:[#allocation2 + $0x40] sm:$0xff] }
  0x1f   :  { %82 = vmatprep.subr.mxu0 %v588_v3  ;;  %v39_v9 = vld [vmem:[#allocation2] sm:$0xff]  ;;  %v606_v10 = vld [vmem:[#allocation2 + $0x38] sm:$0xff]  ;;  %v609_v11 = vld [vmem:[#allocation2 + $0x30] sm:$0xff] }
  0x20   :  { %83 = vmatpush1.msra.mxu0 %v591_v4  ;;  %457 = vmatprep.mubr.f32.mxu1 %v39_v9  ;;  %v612_v12 = vld [vmem:[#allocation2 + $0x28] sm:$0xff]  ;;  %v615_v13 = vld [vmem:[#allocation2 + $0x20] sm:$0xff]  ;;  %v618_v14 = vld [vmem:[#allocation2 + $0x18] sm:$0xff] }
  0x21   :  { %84 = vmatprep.subr.mxu0 %v594_v5  ;;  %v621_v15 = vld [vmem:[#allocation2 + $0x10] sm:$0xff]  ;;  %v40_v16 = vld [vmem:[#allocation2 + $0x8] sm:$0xff]  ;;  %v55_v17 = vld [vmem:[#allocation4] sm:$0xff] }
  0x22   :  { %85 = vmatpush1.msra.mxu0 %v597_v6  ;;  %v56_v18 = vld [vmem:[#allocation4 + $0x8] sm:$0xff] }
  0x23   :  { %86 = vmatprep.subr.mxu0 %v600_v7 }
  0x24   :  { %87 = vmatpush1.msra.mxu0 %v603_v8 }
  0x25   :  { %88 = vmatprep.subr.mxu0 %v606_v10 }
  0x26   :  { %89 = vmatpush1.msra.mxu0 %v609_v11 }
  0x27   :  { %90 = vmatprep.subr.mxu0 %v612_v12 }
  0x28   :  { %91 = vmatpush1.msra.mxu0 %v615_v13 }
  0x29   :  { %92 = vmatprep.subr.mxu0 %v618_v14 }
  0x2a   :  { %93 = vmatpush1.msra.mxu0 %v621_v15 }
  0x2b   :  { %94 = vmatprep.subr.mxu0 %v40_v16 }
  0x2c   :  { %95 = vmatpush1.msra.mxu0 %v39_v9 }
  0x2d   :  { %423 = vmatmul.mubr.msk.f32.vlgmr.msra.gmra.mxu0 %vm57_vm0, %v55_v17 }
  0x2e   :  { %134 = vmatprep.mubr.f32.mxu0 %v562_v0 }
  0x31   :  { %424 = vmatmul.mubr.msk.f32.gmra.mxu0 %vm57_vm0, %v56_v18 }
  0x32   :  { %473 = vmatprep.mubr.f32.mxu0 %v40_v16 }
  0xed   :  { %v130_v19 = vpop.f32.mrf.mxu0 }
  0xef   :  { %v132_v20 = vpop.f32.mrf.mxu0 }
  0xf1   :  { %v136_v21 = vpop.f32.mrf.mxu0 }
  0xf2   :  { %143 = vmax.xlane.f32.xlu0 %v136_v21 }
  0xf3   :  { %v138_v22 = vpop.f32.mrf.mxu0 }
  0xf4   :  { %281 = vmax.xlane.f32.xlu1 %v138_v22 }
  0xf6   :  { %141 = vmax.xlane.f32.xlu0 %v130_v19 }
  0xf8   :  { %279 = vmax.xlane.f32.xlu1 %v132_v20 }
 0x17b   :  { %v144_v23 = vpop.xlane.xlu0 %143 }
 0x17c   :  { %v146_v24 = vsub.f32 %v136_v21, %v144_v23 }
 0x17d   :  { %v282_v25 = vpop.xlane.xlu1 %281 }
 0x17e   :  { %v149_v26 = vmul.f32 1.442695, %v146_v24  ;;  %v284_v27 = vsub.f32 %v138_v22, %v282_v25 }
 0x17f   :  { %v142_v28 = vpop.xlane.xlu0 %141 }
 0x180   :  { %496 = vpow2.f32 %v149_v26  ;;  %v287_v29 = vmul.f32 1.442695, %v284_v27  ;;  %v145_v30 = vsub.f32 %v130_v19, %v142_v28 }
 0x181   :  { %v280_v31 = vpop.xlane.xlu1 %279 }
 0x182   :  { %v147_v32 = vmul.f32 1.442695, %v145_v30  ;;  %v283_v33 = vsub.f32 %v132_v20, %v280_v31  ;;  %498 = vpow2.f32 %v287_v29 }
 0x184   :  { %500 = vpow2.f32 %v147_v32  ;;  %v285_v34 = vmul.f32 1.442695, %v283_v33 }
 0x186   :  { %502 = vpow2.f32 %v285_v34 }
 0x18d   :  { %v497_v35 = vpop.eup %496 }
 0x18e   :  { %153 = vadd.xlane.f32.xlu0 %v497_v35 }
 0x18f   :  { %v499_v36 = vpop.eup %498 }
 0x191   :  { %v501_v37 = vpop.eup %500 }
 0x192   :  { %151 = vadd.xlane.f32.xlu1 %v501_v37  ;;  %291 = vadd.xlane.f32.xlu0 %v499_v36 }
 0x193   :  { %v503_v38 = vpop.eup %502 }
 0x196   :  { %289 = vadd.xlane.f32.xlu1 %v503_v38 }
 0x217   :  { %v154_v39 = vpop.xlane.xlu0 %153 }
 0x218   :  { %504 = vrcp.f32 %v154_v39 }
 0x21b   :  { %v292_v40 = vpop.xlane.xlu0 %291  ;;  %v152_v41 = vpop.xlane.xlu1 %151 }
 0x21c   :  { %506 = vrcp.f32 %v292_v40 }
 0x21d   :  { %508 = vrcp.f32 %v152_v41 }
 0x21f   :  { %v290_v42 = vpop.xlane.xlu1 %289 }
 0x220   :  { %510 = vrcp.f32 %v290_v42 }
 0x225   :  { %v505_v43 = vpop.eup %504 }
 0x226   :  { %v158_v44 = vmul.f32 %v505_v43, %v154_v39 }
 0x228   :  { %v160_v45 = vsub.f32 2.0, %v158_v44 }
 0x229   :  { %v507_v46 = vpop.eup %506 }
 0x22a   :  { %v509_v47 = vpop.eup %508  ;;  %v296_v48 = vmul.f32 %v507_v46, %v292_v40  ;;  %v162_v49 = vmul.f32 %v505_v43, %v160_v45 }
 0x22b   :  { %v157_v50 = vmul.f32 %v509_v47, %v152_v41 }
 0x22c   :  { %v298_v51 = vsub.f32 2.0, %v296_v48  ;;  %v164_v52 = vmul.f32 %v497_v35, %v162_v49 }
 0x22d   :  { %v511_v53 = vpop.eup %510  ;;  %v159_v54 = vsub.f32 2.0, %v157_v50 }
 0x22e   :  { %v300_v55 = vmul.f32 %v507_v46, %v298_v51  ;;  %v295_v56 = vmul.f32 %v511_v53, %v290_v42  ;;  %453 = vmatprep.subr.mxu1 %v164_v52 }
 0x22f   :  { %v161_v57 = vmul.f32 %v509_v47, %v159_v54  ;;  %454 = vmatpush3.xpose.msra.mxu1 %v164_v52 }
 0x230   :  { %v302_v58 = vmul.f32 %v499_v36, %v300_v55  ;;  %v297_v59 = vsub.f32 2.0, %v295_v56 }
 0x231   :  { %v163_v60 = vmul.f32 %v501_v37, %v161_v57 }
 0x232   :  { %v299_v61 = vmul.f32 %v511_v53, %v297_v59  ;;  %469 = vmatprep.subr.mxu0 %v302_v58 }
 0x233   :  { %455 = vmatprep.subr.mxu1 %v163_v60  ;;  %470 = vmatpush3.xpose.msra.mxu0 %v302_v58 }
 0x234   :  { %v301_v62 = vmul.f32 %v503_v38, %v299_v61  ;;  %456 = vmatpush3.xpose.msra.mxu1 %v163_v60 }
 0x235   :  { %485 = vmatprep.subr.mxu1 %v302_v58 }
 0x236   :  { %471 = vmatprep.subr.mxu0 %v301_v62 }
 0x237   :  { %458 = vmatmul.mubr.f32.vlgmr.msra.gmra.mxu1 %v621_v15  ;;  %472 = vmatpush3.xpose.msra.mxu0 %v301_v62 }
 0x238   :  { %487 = vmatpush3.xpose.msra.mxu1 %v302_v58  ;;  %460 = vmatprep.mubr.f32.mxu1 %v615_v13 }
 0x239   :  { %486 = vmatprep.subr.mxu1 %v301_v62 }
 0x23a   :  { %474 = vmatmul.mubr.f32.vlgmr.msra.gmra.mxu0 %v618_v14 }
 0x23b   :  { %461 = vmatmul.mubr.f32.gmra.mxu1 %v609_v11  ;;  %476 = vmatprep.mubr.f32.mxu0 %v612_v12 }
 0x23c   :  { %488 = vmatpush3.xpose.msra.mxu1 %v301_v62  ;;  %463 = vmatprep.mubr.f32.mxu1 %v603_v8 }
 0x23e   :  { %477 = vmatmul.mubr.f32.gmra.mxu0 %v606_v10 }
 0x23f   :  { %464 = vmatmul.mubr.f32.gmra.mxu1 %v597_v6 }
 0x240   :  { %466 = vmatprep.mubr.f32.mxu1 %v591_v4 }
 0x243   :  { %467 = vmatmul.mubr.f32.gmra.mxu1 %v586_v2 }
 0x244   :  { %479 = vmatprep.mubr.f32.mxu1 %v600_v7 }
 0x247   :  { %480 = vmatmul.mubr.f32.vlgmr.msra.gmra.mxu1 %v594_v5 }
 0x248   :  { %482 = vmatprep.mubr.f32.mxu1 %v588_v3 }
 0x24b   :  { %483 = vmatmul.mubr.f32.gmra.mxu1 %v584_v1 }
 0x2f7   :  { %v459_v63 = vpop.f32.mrf.mxu1 }
 0x2f8   :  { %272 = vst.msk [vmem:[%s706_s2 + $0x8] sm:$0xff] %vm270_vm1, %v459_v63 }
 0x2f9   :  { %v231_v0 = vpop.f32.mrf.mxu1 }
 0x2fa   :  { %271 = vst.msk [vmem:[%s706_s2] sm:$0xff] %vm270_vm1, %v231_v0  ;;  %v475_v2 = vpop.f32.mrf.mxu0 }
 0x2fb   :  { %v462_v4 = vpop.f32.mrf.mxu1  ;;  %426 = vst.msk [vmem:[%s706_s2 + $0x48] sm:$0xff] %vm270_vm1, %v475_v2 }
 0x2fc   :  { %274 = vst.msk [vmem:[%s706_s2 + $0x18] sm:$0xff] %vm270_vm1, %v462_v4  ;;  %v369_v1 = vpop.f32.mrf.mxu0 }
 0x2fd   :  { %v241_v3 = vpop.f32.mrf.mxu1  ;;  %425 = vst.msk [vmem:[%s706_s2 + $0x40] sm:$0xff] %vm270_vm1, %v369_v1 }
 0x2fe   :  { %273 = vst.msk [vmem:[%s706_s2 + $0x10] sm:$0xff] %vm270_vm1, %v241_v3  ;;  %v478_v5 = vpop.f32.mrf.mxu0 }
 0x2ff   :  { %v465_v6 = vpop.f32.mrf.mxu1  ;;  %428 = vst.msk [vmem:[%s706_s2 + $0x58] sm:$0xff] %vm270_vm1, %v478_v5 }
 0x300   :  { %276 = vst.msk [vmem:[%s706_s2 + $0x28] sm:$0xff] %vm270_vm1, %v465_v6  ;;  %v379_v7 = vpop.f32.mrf.mxu0 }
 0x301   :  { %v251_v8 = vpop.f32.mrf.mxu1  ;;  %427 = vst.msk [vmem:[%s706_s2 + $0x50] sm:$0xff] %vm270_vm1, %v379_v7 }
 0x302   :  { %275 = vst.msk [vmem:[%s706_s2 + $0x20] sm:$0xff] %vm270_vm1, %v251_v8 }
 0x303   :  { %v468_v9 = vpop.f32.mrf.mxu1 }
 0x304   :  { %278 = vst.msk [vmem:[%s706_s2 + $0x38] sm:$0xff] %vm270_vm1, %v468_v9 }
 0x305   :  { %v261_v10 = vpop.f32.mrf.mxu1 }
 0x306   :  { %277 = vst.msk [vmem:[%s706_s2 + $0x30] sm:$0xff] %vm270_vm1, %v261_v10 }
 0x307   :  { %v481_v11 = vpop.f32.mrf.mxu1 }
 0x308   :  { %430 = vst.msk [vmem:[%s706_s2 + $0x68] sm:$0xff] %vm270_vm1, %v481_v11 }
 0x309   :  { %v389_v12 = vpop.f32.mrf.mxu1 }
 0x30a   :  { %429 = vst.msk [vmem:[%s706_s2 + $0x60] sm:$0xff] %vm270_vm1, %v389_v12 }
 0x30b   :  { %v484_v13 = vpop.f32.mrf.mxu1 }
 0x30c   :  { %432 = vst.msk [vmem:[%s706_s2 + $0x78] sm:$0xff] %vm270_vm1, %v484_v13 }
 0x30d   :  { %v399_v14 = vpop.f32.mrf.mxu1 }
 0x30e   :  { %431 = vst.msk [vmem:[%s706_s2 + $0x70] sm:$0xff] %vm270_vm1, %v399_v14 }
 0x30f   :  { %421 = vsyncpa [#allocation3], 1 }
 0x310   :  { %422 = vsyncpa [#allocation5], 1 }

</bundles_post_ra>
